<compile_context>
chip_gen: v7x
topology: tpu7x:2x2x1
jax: 0.10.0
libtpu: 0.0.40
codegen_flags: <defaults>
</compile_context>

<pallas_src>
import jax
import jax.numpy as jnp
import numpy as np
from jax.experimental import pallas as pl
from jax.experimental.pallas import tpu as pltpu


def _fnet_kernel(x_ref, cn_ref, sn_ref, cdsd_ref, o_ref):
    """out = C_N @ x @ C_D - S_N @ x @ S_D for one batch tile.

    x_ref:    (TB, N, D)  activations (native dtype)
    cn_ref:   (N, N)      cos DFT matrix, seq axis       (bf16)
    sn_ref:   (N, N)      sin DFT matrix, seq axis       (bf16)
    cdsd_ref: (D, 2*D)    [C_D | S_D] fused, hidden axis (bf16)
    o_ref:    (TB, N, D)  f32 output
    """
    TB, N, D = x_ref.shape

    # ---- hidden-axis (dim=-1) DFT ------------------------------------------
    # Flatten the batch tile into the sublane axis so the MXU sees one wide,
    # lane-dense (TB*N, D) @ (D, 2D) matmul with f32 accumulation.
    x2 = x_ref[...].astype(jnp.bfloat16).reshape(TB * N, D)
    u = jnp.dot(x2, cdsd_ref[...], preferred_element_type=jnp.float32)  # (TB*N, 2D)
    u_bf = u.astype(jnp.bfloat16)          # single cast, reused by both halves

    cn = cn_ref[...]
    sn = sn_ref[...]

    # ---- seq-axis (dim=-2) DFT ---------------------------------------------
    # TB is a small static tile -> unrolled plain 2-D MXU matmuls per row.
    for b in range(TB):
        uc_b = u_bf[b * N:(b + 1) * N, :D]     # x_b @ C_D   (N, D)
        us_b = u_bf[b * N:(b + 1) * N, D:]     # x_b @ S_D   (N, D)
        res = (jnp.dot(cn, uc_b, preferred_element_type=jnp.float32)
               - jnp.dot(sn, us_b, preferred_element_type=jnp.float32))
        o_ref[b] = res.astype(o_ref.dtype)


def _dft_cos_sin(m: int):
    idx = np.arange(m)
    ang = 2.0 * np.pi * np.outer(idx, idx) / m
    return np.cos(ang), np.sin(ang)


def _choose_batch_tile(B: int, N: int, D: int) -> int:
    """Batch rows per grid step: amortize ~0.35us/step overhead, stay inside
    the VMEM budget, keep >= 2 grid steps (megacore) and an exact division."""
    bytes_per_row = N * D * 4
    cap = max(1, (2 * 1024 * 1024) // max(1, bytes_per_row))  # ~2 MiB of x / block
    cap = min(cap, 8)                                         # bound static unroll
    tb = max(1, min(B, cap))
    while tb > 1 and pl.cdiv(B, tb) < 2:
        tb -= 1
    while B % tb != 0:                                        # no padded tail blocks
        tb -= 1
    return tb


@jax.jit
def fnet_block(x):
    """real(fft(fft(x, axis=-1), axis=-2)) for real x of shape (B, N, D)."""
    B, N, D = x.shape
    cn_np, sn_np = _dft_cos_sin(N)
    cd_np, sd_np = _dft_cos_sin(D)

    # bf16 MXU operands; f32 accumulation happens inside the kernel.
    cn = jnp.asarray(cn_np, dtype=jnp.bfloat16)
    sn = jnp.asarray(sn_np, dtype=jnp.bfloat16)
    cdsd = jnp.asarray(np.concatenate([cd_np, sd_np], axis=1), dtype=jnp.bfloat16)

    tb = _choose_batch_tile(B, N, D)
    grid = (B // tb,)

    grid_spec = pltpu.PrefetchScalarGridSpec(
        num_scalar_prefetch=0,
        grid=grid,
        in_specs=[
            pl.BlockSpec((tb, N, D), lambda i: (i, 0, 0)),   # x: TB batch rows
            pl.BlockSpec((N, N), lambda i: (0, 0)),          # C_N (constant index)
            pl.BlockSpec((N, N), lambda i: (0, 0)),          # S_N (constant index)
            pl.BlockSpec((D, 2 * D), lambda i: (0, 0)),      # [C_D | S_D] fused
        ],
        out_specs=pl.BlockSpec((tb, N, D), lambda i: (i, 0, 0)),
    )

    # NOTE: for very large N/D (e.g. D >= 2048 on v7x's 64 MiB VMEM) the DFT
    # matrices would need a K-tiled ("arbitrary") grid axis with an f32
    # accumulator; not needed at these block sizes.
    return pl.pallas_call(
        _fnet_kernel,
        out_shape=jax.ShapeDtypeStruct((B, N, D), jnp.float32),
        grid_spec=grid_spec,
        compiler_params=pltpu.CompilerParams(
            dimension_semantics=("parallel",),
            vmem_limit_bytes=32 * 1024 * 1024,
        ),
    )(x, cn, sn, cdsd)


if __name__ == "__main__":
    key = jax.random.PRNGKey(0)
    B, N, D = 2, 8, 32            # (batch, seq, hidden)
    x = jax.random.normal(key, (B, N, D), dtype=jnp.float32)

    out = jax.block_until_ready(fnet_block(x))

    # reference: the exact PyTorch semantics, via jnp.fft
    ref = jnp.fft.fft(jnp.fft.fft(x, axis=-1), axis=-2).real
    err = float(jnp.max(jnp.abs(out - ref)))
    scale = float(jnp.max(jnp.abs(ref)))
    # bf16 MXU operands with f32 accumulation: allow a few % of dynamic range
    if not err <= 3e-2 * scale + 5e-2:
        raise AssertionError(
            f"Pallas FNetBlock mismatch vs FFT reference: max_err={err}, scale={scale}")

    print("KERNEL_OK")
</pallas_src>

<mosaic_0001>
module attributes {stable_mosaic.version = 11 : i64} {
  func.func @_fnet_kernel(%arg0: i32, %arg1: memref<1x8x32xf32, #tpu.memory_space<vmem>>, %arg2: memref<8x8xbf16, #tpu.memory_space<vmem>>, %arg3: memref<8x8xbf16, #tpu.memory_space<vmem>>, %arg4: memref<32x64xbf16, #tpu.memory_space<vmem>>, %arg5: memref<1x8x32xf32, #tpu.memory_space<vmem>>) attributes {dimension_semantics = [#tpu.dimension_semantics<parallel>], iteration_bounds = array<i64: 2>, scalar_prefetch = 0 : i64, scratch_operands = 0 : i64, tpu.core_type = #tpu.core_type<tc>, window_params = [{transform_indices = @transform_0, window_bounds = array<i64: 1, 8, 32>}, {pipeline_mode = #tpu.pipeline_mode<synchronous>, transform_indices = @transform_1, window_bounds = array<i64: 8, 8>}, {pipeline_mode = #tpu.pipeline_mode<synchronous>, transform_indices = @transform_2, window_bounds = array<i64: 8, 8>}, {pipeline_mode = #tpu.pipeline_mode<synchronous>, transform_indices = @transform_3, window_bounds = array<i64: 32, 64>}, {transform_indices = @transform_4, window_bounds = array<i64: 1, 8, 32>}]} {
    %c0 = arith.constant 0 : index
    %c0_0 = arith.constant 0 : index
    %c0_1 = arith.constant 0 : index
    %0 = vector.load %arg1[%c0, %c0_0, %c0_1] : memref<1x8x32xf32, #tpu.memory_space<vmem>>, vector<1x8x32xf32>
    %1 = arith.truncf %0 : vector<1x8x32xf32> to vector<1x8x32xbf16>
    %2 = vector.shape_cast %1 : vector<1x8x32xbf16> to vector<8x32xbf16>
    %c0_2 = arith.constant 0 : index
    %c0_3 = arith.constant 0 : index
    %3 = vector.load %arg4[%c0_2, %c0_3] : memref<32x64xbf16, #tpu.memory_space<vmem>>, vector<32x64xbf16>
    %cst = arith.constant dense<0.000000e+00> : vector<8x64xf32>
    %4 = tpu.matmul %2, %3, %cst {dimension_numbers = #tpu.dot_dimension_numbers<[1], [0], [0], [1], [0, 0, 1, 1], [], []>} : vector<8x32xbf16>, vector<32x64xbf16>, vector<8x64xf32> -> vector<8x64xf32>
    %5 = arith.truncf %4 : vector<8x64xf32> to vector<8x64xbf16>
    %c0_4 = arith.constant 0 : index
    %c0_5 = arith.constant 0 : index
    %6 = vector.load %arg2[%c0_4, %c0_5] : memref<8x8xbf16, #tpu.memory_space<vmem>>, vector<8x8xbf16>
    %c0_6 = arith.constant 0 : index
    %c0_7 = arith.constant 0 : index
    %7 = vector.load %arg3[%c0_6, %c0_7] : memref<8x8xbf16, #tpu.memory_space<vmem>>, vector<8x8xbf16>
    %8 = vector.extract_strided_slice %5 {offsets = [0, 0], sizes = [8, 32], strides = [1, 1]} : vector<8x64xbf16> to vector<8x32xbf16>
    %9 = vector.extract_strided_slice %5 {offsets = [0, 32], sizes = [8, 32], strides = [1, 1]} : vector<8x64xbf16> to vector<8x32xbf16>
    %cst_8 = arith.constant dense<0.000000e+00> : vector<8x32xf32>
    %10 = tpu.matmul %6, %8, %cst_8 {dimension_numbers = #tpu.dot_dimension_numbers<[1], [0], [0], [1], [0, 0, 1, 1], [], []>} : vector<8x8xbf16>, vector<8x32xbf16>, vector<8x32xf32> -> vector<8x32xf32>
    %cst_9 = arith.constant dense<0.000000e+00> : vector<8x32xf32>
    %11 = tpu.matmul %7, %9, %cst_9 {dimension_numbers = #tpu.dot_dimension_numbers<[1], [0], [0], [1], [0, 0, 1, 1], [], []>} : vector<8x8xbf16>, vector<8x32xbf16>, vector<8x32xf32> -> vector<8x32xf32>
    %12 = arith.subf %10, %11 : vector<8x32xf32>
    %c0_10 = arith.constant 0 : index
    %c0_11 = arith.constant 0 : index
    %c0_12 = arith.constant 0 : index
    %13 = vector.load %arg5[%c0_10, %c0_11, %c0_12] : memref<1x8x32xf32, #tpu.memory_space<vmem>>, vector<1x8x32xf32>
    %14 = vector.shape_cast %13 : vector<1x8x32xf32> to vector<8x32xf32>
    %15 = vector.shape_cast %12 : vector<8x32xf32> to vector<1x8x32xf32>
    tpu.vector_store %arg5[%c0_10, %c0_11, %c0_12], %15 {strides = array<i32>} : memref<1x8x32xf32, #tpu.memory_space<vmem>>, vector<1x8x32xf32>,
    return
  }
  func.func @transform_0(%arg0: i32) -> (i32, i32, i32) {
    %c0_i32 = arith.constant 0 : i32
    %c0_i32_0 = arith.constant 0 : i32
    %c0_i32_1 = arith.constant 0 : i32
    return %arg0, %c0_i32, %c0_i32_0 : i32, i32, i32
  }
  func.func @transform_1(%arg0: i32) -> (i32, i32) {
    %c0_i32 = arith.constant 0 : i32
    %c0_i32_0 = arith.constant 0 : i32
    %c0_i32_1 = arith.constant 0 : i32
    return %c0_i32, %c0_i32_0 : i32, i32
  }
  func.func @transform_2(%arg0: i32) -> (i32, i32) {
    %c0_i32 = arith.constant 0 : i32
    %c0_i32_0 = arith.constant 0 : i32
    %c0_i32_1 = arith.constant 0 : i32
    return %c0_i32, %c0_i32_0 : i32, i32
  }
  func.func @transform_3(%arg0: i32) -> (i32, i32) {
    %c0_i32 = arith.constant 0 : i32
    %c0_i32_0 = arith.constant 0 : i32
    %c0_i32_1 = arith.constant 0 : i32
    return %c0_i32, %c0_i32_0 : i32, i32
  }
  func.func @transform_4(%arg0: i32) -> (i32, i32, i32) {
    %c0_i32 = arith.constant 0 : i32
    %c0_i32_0 = arith.constant 0 : i32
    %c0_i32_1 = arith.constant 0 : i32
    return %arg0, %c0_i32, %c0_i32_0 : i32, i32, i32
  }
}

</mosaic_0001>

<bundles_post_ra>
// kernel: fnet_block.1
= control target key start
LH: loop header
LB: loop body
LE: loop exit
PB: predicated region body
PF: predicated region fallthrough
CT: control target
= control target key end

     0   :  { %9 = vsyncpa [#allocation3], 0  ;;  %s1056_s0 = inlined_call_operand.hbm [shape: f32[2,8,32], index: 0, kind: input, shape index: {}]   ;;  %s1057_s1 = inlined_call_operand.hbm [shape: bf16[8,8], index: 1, kind: input, shape index: {}]   ;;  %s1058_s2 = inlined_call_operand.vmem [shape: bf16[8,8], index: 2, kind: input, shape index: {}]   ;;  %s1059_s3 = inlined_call_operand.hbm [shape: bf16[32,64], index: 3, kind: input, shape index: {}]   ;;  %s1060_s4 = inlined_call_operand.hbm [shape: f32[2,8,32], index: 4, kind: output, shape index: {}]  }
   0x1   :  { %11 = vsyncpa [#allocation3 + $0x1], 0 }
   0x2   :  { %12 = vsyncpa [#allocation6], 0 }
   0x3   :  { %13 = vsyncpa [#allocation4], 0 }
   0x4   :  { %15 = vsyncpa [#allocation4 + $0x1], 0  ;;  %s822_s15 = smov 0   ;;  %s824_s16 = smov 0  }
   0x5   :  { %s826_s17 = smov 0   ;;  %s828_s18 = smov 0  }
   0x6 LB: > { %s843_s19 = sadd.s32 4294967295, %s786_s18   ;;  %s508_s20 = sadd.s32 4294967294, %s786_s18   ;;  %s786_s18 = sphi %s828_s18, %s1080_s18   ;;  %s782_s17 = sphi %s826_s17, %s1079_s17   ;;  %s778_s16 = sphi %s824_s16, %s1078_s16   ;;  %s774_s15 = sphi %s822_s15, %s1077_s15  }
   0x7   : > { %p41_p0 = scmp.ne.s32.totalorder %s778_s16, %s774_s15  ;;  %p1061_p1 = scmp.eq.s32.totalorder %s843_s19, 0 }
   0x8   : > { %p134_p3 = scmp.eq.s32.totalorder %s508_s20, 1  ;;  %p509_p5 = scmp.ge.s32.totalorder %s786_s18, 1 }
   0x9   : > { %p852_p4 = por %p1061_p1, %p41_p0  ;;  %p141_p7 = scmp.lt.s32.totalorder %s786_s18, 3 }
   0xa   : > { %p857_p6 = por %p134_p3, %p41_p0  ;;  %s788_s24 = smov [#allocation5]  }
   0xb   : > { %s1064_s21 = scalar_select %p852_p4, 1, 0 }
   0xc   : > { %s1065_s22 = scalar_select %p857_p6, 1, 0 }
   0xd   : > { %p862_p8 = pnand %p509_p5, %p141_p7  ;;  %s154_s25 = sshll.u32 %s788_s24, 4  ;;  %s155_s25 = int_to_ptr.vmem [resolvable:$true] %s154_s25 }
   0xe   : > { %s789_s26 = smov [#allocation7]   ;;  %s630_s5 = scalar_lea.hbm %s1057_s1, 64 }
   0xf   : > { %s1066_s23 = scalar_select %p862_p8, 1, 0 }
  0x10   : > { %p568_p10 = pneg %p862_p8  ;;  %s167_s27 = sshll.u32 %s789_s26, 4  ;;  %s875_s27 = int_to_ptr.vmem [resolvable:$true] %s167_s27 }
  0x11   : > { %p631_p12 = scmp.ne.s32.totalorder %s1057_s1, %s630_s5  ;;  %p637_p5 = scmp.lt.u32.totalorder %s630_s5, %s1057_s1 }
  0x12   : > { %p871_p11 = pnand %p568_p10, %p1061_p1 }
  0x14   : > { %p632_p13 = pneg %p871_p11 }
  0x16   : > { %p633_p0 = pnand %p632_p13, %p631_p12 }
  0x18   : > { %p634_p3 = pneg %p633_p0 }
  0x1a   : > { %p639_p7 = pnand %p637_p5, %p634_p3 }
  0x1c   : > { %642 = shalt.err (!%p639_p7)
}
  0x1d   : > { %s643_s10 = scalar_lea.vmem %s155_s25, 64  ;;  %p651_p2 = scmp.lt.s32.totalorder %s155_s25, %s155_s25 }
  0x1e   : > { %p644_p10 = scmp.ne.s32.totalorder %s155_s25, %s643_s10  ;;  %p652_p6 = scmp.lt.s32.totalorder %s643_s10, %s643_s10 }
  0x20   : > { %p646_p9 = pnand %p644_p10, %p632_p13  ;;  %p653_p4 = por %p652_p6, %p651_p2 }
  0x22   : > { %p647_p1 = pneg %p646_p9 }
  0x24   : > { %p654_p8 = pnand %p653_p4, %p647_p1 }
  0x26   : > { %657 = shalt.err (!%p654_p8)
}
  0x27   : > { %571 = dma.hbm_to_vmem [thread:$0]  (!%p871_p11), %s1057_s1, 64, %s155_s25, [#allocation6]  }
  0x28   : > { %s658_s20 = scalar_lea.hbm %s1059_s3, 256 }
  0x29   : > { %p659_p9 = scmp.ne.s32.totalorder %s1059_s3, %s658_s20  ;;  %p665_p4 = scmp.lt.u32.totalorder %s658_s20, %s1059_s3 }
  0x2b   : > { %p661_p2 = pnand %p659_p9, %p632_p13 }
  0x2d   : > { %p662_p1 = pneg %p661_p2 }
  0x2f   : > { %p667_p6 = pnand %p665_p4, %p662_p1 }
  0x31   : > { %670 = shalt.err (!%p667_p6)
}
  0x32   : > { %s671_s25 = scalar_lea.vmem %s875_s27, 256  ;;  %p679_p3 = scmp.lt.s32.totalorder %s875_s27, %s875_s27 }
  0x33   : > { %p672_p8 = scmp.ne.s32.totalorder %s875_s27, %s671_s25  ;;  %p680_p5 = scmp.lt.s32.totalorder %s671_s25, %s671_s25 }
  0x35   : > { %p674_p12 = pnand %p672_p8, %p632_p13  ;;  %p681_p7 = por %p680_p5, %p679_p3 }
  0x37   : > { %p675_p0 = pneg %p674_p12 }
  0x39   : > { %p682_p10 = pnand %p681_p7, %p675_p0 }
  0x3b   : > { %685 = shalt.err (!%p682_p10)
}
  0x3c   : > { %s790_s5 = smov 64   ;;  %s791_s6 = smov 4  }
  0x3d   : > { %574 = dma.hbm_to_vmem [thread:$0]  (!%p871_p11), %s1059_s3, 256, %s875_s27, [#allocation6], %s790_s5, %s790_s5, %s791_s6  }
  0x3e   : > { %s925_s9 = sadd.s32 1, %s786_s18   ;;  %s28_s10 = sadd.s32 1, %s782_s17 }
  0x3f   : > { %s25_s11 = ssub.s32 %s786_s18, %s925_s9  ;;  %p35_p13 = scmp.ne.s32.totalorder %s782_s17, %s778_s16 }
  0x40   : > { %p26_p9 = scmp.eq.s32.totalorder %s25_s11, 0  ;;  %p36_p2 = scmp.eq.s32.totalorder %s786_s18, 0 }
  0x41   : > { %p1068_p1 = scmp.eq.s32.totalorder %s843_s19, 1  ;;  %p585_p6 = scmp.lt.s32.totalorder %s786_s18, 2 }
  0x42   : > { %s941_s13 = scalar_select %p26_p9, %s782_s17, %s28_s10  }
  0x43   : > { %p935_p4 = por %p1068_p1, %p35_p13  ;;  %p37_p8 = por %p36_p2, %p35_p13 }
  0x44   : > { %s181_s28 = sand.u32 1, %s782_s17   ;;  %s514_s27 = sshll.u32 %s786_s18, 7 }
  0x45   : > { %s513_s14 = sshll.u32 %s181_s28, 3  ;;  %s948_s26 = scalar_lea.hbm %s1056_s0, %s514_s27 }
  0x46   : > { %s185_s29 = scalar_lea.vmem [#allocation2], %s513_s14  ;;  %p952_p11 = pnand %p585_p6, %p37_p8 }
  0x47   : > { %s192_s30 = sshll.u32 %s185_s29, 4  ;;  %s182_s5 = scalar_lea.sflag [#allocation3], %s181_s28  ;;  %s950_s30 = int_to_ptr.vmem [resolvable:$true] %s192_s30 }
  0x48   : > { %s686_s6 = scalar_lea.hbm %s948_s26, 128  ;;  %p688_p0 = pneg %p952_p11 }
  0x49   : > { %p687_p12 = scmp.ne.s32.totalorder %s948_s26, %s686_s6  ;;  %s691_s10 = scalar_lea.hbm %s1056_s0, 256 }
  0x4a   : > { %p692_p7 = scmp.lt.u32.totalorder %s948_s26, %s1056_s0  ;;  %p693_p10 = scmp.lt.u32.totalorder %s691_s10, %s686_s6 }
  0x4b   : > { %p689_p3 = pnand %p688_p0, %p687_p12  ;;  %p695_p9 = scmp.lt.u32.totalorder %s686_s6, %s948_s26 }
  0x4c   : > { %p694_p13 = por %p693_p10, %p692_p7 }
  0x4d   : > { %p690_p5 = pneg %p689_p3 }
  0x4e   : > { %p696_p2 = por %p695_p9, %p694_p13 }
  0x50   : > { %p697_p1 = pnand %p696_p2, %p690_p5 }
  0x52   : > { %700 = shalt.err (!%p697_p1)
}
  0x53   : > { %s701_s28 = scalar_lea.vmem %s950_s30, 128  ;;  %s792_s27 = smov [#allocation2]  }
  0x54   : > { %p702_p6 = scmp.ne.s32.totalorder %s950_s30, %s701_s28  ;;  %s706_s20 = sshll.u32 %s792_s27, 4  ;;  %s707_s20 = int_to_ptr.vmem [resolvable:$false] %s706_s20 }
  0x55   : > { %s708_s24 = scalar_lea.vmem %s707_s20, 256  ;;  %p709_p3 = scmp.lt.s32.totalorder %s950_s30, %s707_s20 }
  0x56   : > { %p704_p8 = pnand %p702_p6, %p688_p0  ;;  %p710_p7 = scmp.lt.s32.totalorder %s708_s24, %s701_s28 }
  0x58   : > { %p705_p12 = pneg %p704_p8  ;;  %p711_p10 = por %p710_p7, %p709_p3 }
  0x5a   : > { %p712_p13 = pnand %p711_p10, %p705_p12 }
  0x5c   : > { %715 = shalt.err (!%p712_p13)
}
  0x5d   : > { %578 = dma.hbm_to_vmem [thread:$0]  (!%p952_p11), %s948_s26, 128, %s950_s30, %s182_s5  }
  0x5e   : > { %p1071_p5 = scmp.ne.s32.totalorder %s1066_s23, 0 }
  0x5f   : > { %s984_s29 = sand.u32 (!%p1071_p5), 1, %s778_s16   ;;  %p1072_p0 = scmp.ne.s32.totalorder (!%p1071_p5), %s1064_s21, 0 }
  0x60   : > { %201 = sbr.rel (%p1071_p5) target bundleno = 678 (0x2a6), region = 36  ;;  %s516_s6 = sshll.u32 (!%p1071_p5), %s984_s29, 3 }
  0x61   : > { %s204_s7 = scalar_lea.sflag (!%p1071_p5), [#allocation3], %s984_s29  ;;  %s207_s8 = scalar_lea.vmem (!%p1071_p5), [#allocation2], %s516_s6 }
  0x67   : > { %761 = dma.done.wait (%p1072_p0), %s204_s7, 128  }
  0x68   : > { %763 = vsyncadd (%p1072_p0), %s204_s7, 4294967168  ;;  %p1073_p11 = scmp.eq.s32.totalorder %s843_s19, 0 }
  0x6a   : > { %765 = dma.done.wait (%p1073_p11), [#allocation6], 320   ;;  %p1074_p9 = pmov %p1073_p11 }
  0x6b   : > { %v793_v0 = vmov 0.0   ;;  %vm794_vm0 = vmmov 0   ;;  %v628_v1 = vld [vmem:[#allocation7] sm:$0xff]   ;;  %v629_v2 = vld [vmem:[#allocation7 + $0x8] sm:$0xff]   ;;  %vm259_vm1 = vcmask 261120   ;;  %vm310_vm2 = vcmask 1043456  }
  0x6c   : > { %767 = vsyncadd (%p1074_p9), [#allocation6], 4294966976  ;;  %536 = vmatprep.subr.bf16.mxu0 %v793_v0  ;;  %540 = vmatprep.mubr.msk.bf16.mxu0 %vm794_vm0, %v793_v0  ;;  %v241_v3 = vld [vmem:[%s207_s8] sm:$0xff]  ;;  %s795_s21 = smov 96   ;;  %v304_v11 = vld [vmem:[#allocation5] sm:$0xf] }
  0x6d   : > { %544 = vmatprep.subr.bf16.mxu1 %v793_v0  ;;  %546 = vmatprep.mubr.msk.bf16.mxu1 %vm794_vm0, %v793_v0  ;;  %v242_v4 = vpack.c.bf16 %v241_v3, %v241_v3  ;;  %vm306_vm3 = vcmask 64512   ;;  %v305_v14 = vld [vmem:[%s1058_s2] sm:$0xf]  ;;  %s526_s30 = sshll.u32 %s843_s19, 7  ;;  %s239_s25 = scalar_lea.vmem [#allocation8], %s516_s6 }
  0x6e   : > { %537 = vmatpush3.bf16.msra.mxu0 %v628_v1  ;;  %s419_s5 = sshll.u32 %s239_s25, 4  ;;  %s1011_s14 = scalar_lea.hbm %s1060_s4, %s526_s30  ;;  %s1013_s5 = int_to_ptr.vmem [resolvable:$true] %s419_s5 }
  0x6f   : > { %538 = vmatprep.subr.bf16.mxu0 %v793_v0  ;;  %s406_s19 = scalar_lea.sflag [#allocation4], %s984_s29  ;;  %s716_s28 = scalar_lea.vmem %s1013_s5, 128 }
  0x70   : > { %p717_p2 = scmp.ne.s32.totalorder %s1013_s5, %s716_s28  ;;  %s796_s27 = smov [#allocation8]  }
  0x71   : > { %s720_s20 = sshll.u32 %s796_s27, 4  ;;  %s721_s20 = int_to_ptr.vmem [resolvable:$false] %s720_s20 }
  0x72   : > { %539 = vmatpush3.bf16.msra.mxu0 %v629_v2  ;;  %p718_p1 = pnand %p717_p2, %p935_p4  ;;  %s722_s24 = scalar_lea.vmem %s721_s20, 256 }
  0x73   : > { %p723_p8 = scmp.lt.s32.totalorder %s1013_s5, %s721_s20  ;;  %p724_p12 = scmp.lt.s32.totalorder %s722_s24, %s716_s28 }
  0x74   : > { %p719_p6 = pneg %p718_p1 }
  0x75   : > { %541 = vmatmul.mubr.msk.bf16.vlgmr.msra.gmra.mrb[0].mxu0 %vm259_vm1, %v242_v4  ;;  %p725_p3 = por %p724_p12, %p723_p8 }
  0x77   : > { %p726_p7 = pnand %p725_p3, %p719_p6 }
 0x148   : > { %v297_v5 = vpop.f32.mrb[0].mxu0 }
 0x149   : > { %v303_v6 = vpack.c.bf16 %v297_v5, %v297_v5  ;;  %v542_v7 = vpop.f32.mrb[1].mxu0 }
 0x14a   : > { %v300_v8 = vpop.f32.mrb[2].mxu0 }
 0x14b   : > { %v543_v9 = vpop.f32.mrb[3].mxu0  ;;  %355 = vrot.lane.b32.xlu0 %v303_v6, %s795_s21  ;;  %v312_v10 = vsel %vm310_vm2, %v303_v6, 0 }
 0x14c   : > { %545 = vmatpush3.bf16.msra.mxu1 %v312_v10 }
 0x14d   : > { %550 = vmatprep.subr.bf16.mxu1 %v793_v0 }
 0x14f   : > { %547 = vmatmul.mubr.msk.bf16.vlgmr.msra.gmra.mrb[0].mxu1 %vm306_vm3, %v304_v11 }
 0x150   : > { %552 = vmatprep.mubr.msk.bf16.mxu1 %vm794_vm0, %v793_v0 }
 0x1bd   : > { %v356_v12 = vpop.permute.xlu0 %355 }
 0x1be   : > { %v361_v13 = vsel %vm310_vm2, %v356_v12, 0 }
 0x1bf   : > { %551 = vmatpush3.bf16.msra.mxu1 %v361_v13 }
 0x1c2   : > { %553 = vmatmul.mubr.msk.bf16.vlgmr.msra.gmra.mrb[4].mxu1 %vm306_vm3, %v305_v14 }
 0x222   : > { %v348_v15 = vpop.f32.mrb[0].mxu1 }
 0x223   : > { %v548_v16 = vpop.f32.mrb[1].mxu1 }
 0x224   : > { %v351_v17 = vpop.f32.mrb[2].mxu1 }
 0x225   : > { %v549_v18 = vpop.f32.mrb[3].mxu1 }
 0x295   : > { %v397_v19 = vpop.f32.mrb[4].mxu1 }
 0x296   : > { %v403_v20 = vsub.f32 %v348_v15, %v397_v19  ;;  %v554_v21 = vpop.f32.mrb[5].mxu1 }
 0x297   : > { %v400_v22 = vpop.f32.mrb[6].mxu1 }
 0x298   : > { %v555_v23 = vpop.f32.mrb[7].mxu1  ;;  %404 = vst.msk [vmem:[%s239_s25] sm:$0xff] %vm259_vm1, %v403_v20 }
 0x299   : > { %729 = shalt.err (!%p726_p7)
}
 0x29a   : > { %s730_s29 = scalar_lea.hbm %s1011_s14, 128  ;;  %s734_s8 = scalar_lea.hbm %s1060_s4, 256 }
 0x29b   : > { %p731_p10 = scmp.ne.s32.totalorder %s1011_s14, %s730_s29  ;;  %p735_p0 = scmp.lt.u32.totalorder %s1011_s14, %s1060_s4 }
 0x29c   : > { %p736_p11 = scmp.lt.u32.totalorder %s734_s8, %s730_s29  ;;  %p738_p2 = scmp.lt.u32.totalorder %s730_s29, %s1011_s14 }
 0x29d   : > { %p732_p13 = pnand %p731_p10, %p935_p4 }
 0x29e   : > { %p737_p9 = por %p736_p11, %p735_p0 }
 0x29f   : > { %p733_p5 = pneg %p732_p13 }
 0x2a0   : > { %p739_p1 = por %p738_p2, %p737_p9 }
 0x2a2   : > { %p740_p6 = pnand %p739_p1, %p733_p5 }
 0x2a4   : > { %743 = shalt.err (!%p740_p6)
}
 0x2a5   : > { %566 = dma.vmem_to_hbm [thread:$0]  (%p935_p4), %s1013_s5, 128, %s1011_s14, %s406_s19  }
 0x2a6 PF: > { %s431_s26 = sand.u32 1, %s774_s15   ;;  %p1075_p8 = scmp.ne.s32.totalorder %s1065_s22, 0 }
 0x2a7   : > { %p1076_p12 = scmp.ge.s32.totalorder %s786_s18, 2  ;;  %s432_s30 = scalar_lea.sflag [#allocation4], %s431_s26 }
 0x2a9   : > { %p580_p3 = pnand %p1076_p12, %p1075_p8 }
 0x2ab   : > { %769 = dma.done.wait (!%p580_p3), %s432_s30, 128  }
 0x2ac   : > { %771 = vsyncadd (!%p580_p3), %s432_s30, 4294967168  ;;  %p18_p7 = scmp.ge.s32.totalorder %s925_s9, 4   ;;  %s1077_s15 = smov %s778_s16 }
 0x2ad   : > { %s1078_s16 = smov %s782_s17  ;;  %s1079_s17 = smov %s941_s13 }
 0x2ae   : > { %s1080_s18 = smov %s925_s9  ;;  %20 = sbr.rel (!%p18_p7) target bundleno = 6 (0x6), region = 89 }
 0x2b5   :  { %437 = vsyncpa [#allocation3], 1 }
 0x2b6   :  { %439 = vsyncpa [#allocation3 + $0x1], 1 }
 0x2b7   :  { %440 = vsyncpa [#allocation6], 1 }
 0x2b8   :  { %441 = vsyncpa [#allocation4], 1 }
 0x2b9   :  { %443 = vsyncpa [#allocation4 + $0x1], 1 }

</bundles_post_ra>
